<compile_context>
chip_gen: v6e
topology: v6e:2x2x1
jax: 0.10.0
libtpu: 0.0.40
codegen_flags: <defaults>
</compile_context>

<pallas_src>
import jax
import jax.numpy as jnp
from jax.experimental import pallas as pl
from jax.experimental.pallas import tpu as pltpu


def _h_sigmoid_kernel(x_ref, o_ref):
    x = x_ref[...]
    # relu6(x + 3) / 6 ; constants are weakly typed so bf16 stays bf16.
    o_ref[...] = (jnp.clip(x + 3.0, 0.0, 6.0) * (1.0 / 6.0)).astype(o_ref.dtype)


_LANE_CANDIDATES = (8192, 4096, 2048, 1024, 512, 256, 128)
_MAX_COLS = 8192


def _cdiv(a, b):
    return -(-a // b)


def _round_up(a, b):
    return _cdiv(a, b) * b


def _sublane(itemsize):
    # Sublane packing granularity per dtype width.
    return {1: 32, 2: 16}.get(itemsize, 8)


def _tensorcores_per_device():
    """TensorCores behind one JAX device (2 on megacore chips: v4/v5p/v7x)."""
    try:
        kind = getattr(jax.devices()[0], "device_kind", "").lower()
    except Exception:
        return 1
    return 2 if any(tag in kind for tag in ("v4", "v5p", "v7")) else 1


def _choose_cols(total):
    """Widest lane width that makes the flatten a pure reshape (no pad)."""
    for c in _LANE_CANDIDATES:
        if total % c == 0:
            return c
    # Rare: no wide multiple of 128 divides the element count. Use the largest
    # divisor <= _MAX_COLS -> still a single HBM pass; only the trailing
    # partial 128-lane chunk of each row uses masked stores.
    best = 1
    i = 1
    while i * i <= total:
        if total % i == 0:
            for d in (i, total // i):
                if best < d <= _MAX_COLS:
                    best = d
        i += 1
    return best


def _pick_block_rows(rows, cols, itemsize, target_block_bytes, num_tc):
    """Sublane-aligned row block of ~target_block_bytes (VMEM-physical)."""
    sub = _sublane(itemsize)
    # Physical bytes per row in VMEM (lanes pad up to a multiple of 128).
    row_bytes = _round_up(cols, 128) * itemsize
    slab_bytes = rows * row_bytes

    block_rows = max(sub, (target_block_bytes // row_bytes) // sub * sub)

    if num_tc > 1:
        # Multi-TensorCore chip: keep the "parallel" axis at >= 4 steps so
        # both cores get work, but never shrink a block below ~1 MiB.
        min_block_bytes = 1024 * 1024
        if slab_bytes >= 4 * min_block_bytes:
            cap = _round_up(_cdiv(rows, 4), sub)
            if cap * row_bytes >= min_block_bytes:
                block_rows = min(block_rows, max(cap, sub))

    if block_rows >= rows:
        block_rows = rows
        # >= 2 grid steps for slabs past ~1 MiB so consecutive steps' input
        # and output DMAs overlap (1-step grids have no pipelining).
        if slab_bytes > 1024 * 1024 and rows > sub:
            half = _round_up(_cdiv(rows, 2), sub)
            if half < rows:
                block_rows = half
    return block_rows


def _run_2d(x2d, block_rows, cols, itemsize):
    rows = x2d.shape[0]
    grid = (_cdiv(rows, block_rows),)

    # Explicit scoped-VMEM budget: in + out blocks, each double-buffered
    # (4 physical blocks) plus headroom; portable across v5e/v6e/v7x.
    sub = _sublane(itemsize)
    phys_block = _round_up(block_rows, sub) * _round_up(cols, 128) * itemsize
    vmem_limit = int(min(max(4 * phys_block + 4 * 1024 * 1024, 16 * 1024 * 1024),
                         64 * 1024 * 1024))

    return pl.pallas_call(
        _h_sigmoid_kernel,
        out_shape=jax.ShapeDtypeStruct(x2d.shape, x2d.dtype),
        grid_spec=pltpu.PrefetchScalarGridSpec(
            num_scalar_prefetch=0,
            grid=grid,
            in_specs=[pl.BlockSpec((block_rows, cols), lambda i: (i, 0))],
            out_specs=pl.BlockSpec((block_rows, cols), lambda i: (i, 0)),
        ),
        compiler_params=pltpu.CompilerParams(
            dimension_semantics=("parallel",),
            vmem_limit_bytes=vmem_limit,
        ),
    )(x2d)


def h_sigmoid(x: jax.Array, *, target_block_bytes: int = 2 * 1024 * 1024) -> jax.Array:
    """Elementwise hard-sigmoid (relu6(x + 3) / 6). Accepts any shape (NCHW expected)."""
    orig_shape = x.shape
    total = x.size
    if total == 0:
        return x
    itemsize = jnp.dtype(x.dtype).itemsize

    cols = _choose_cols(total)      # pure reshape, never a pad
    rows = total // cols
    x2d = x.reshape(rows, cols)
    block_rows = _pick_block_rows(rows, cols, itemsize, target_block_bytes,
                                  _tensorcores_per_device())
    out2d = _run_2d(x2d, block_rows, cols, itemsize)
    return out2d.reshape(orig_shape)


def h_sigmoid_ref(x):
    return jnp.clip(x + 3.0, 0.0, 6.0) / 6.0


if __name__ == "__main__":
    key = jax.random.PRNGKey(0)

    # Main lane-dense path, NCHW f32.
    x = jax.random.normal(key, (2, 4, 16, 16), dtype=jnp.float32) * 4.0
    out = jax.block_until_ready(h_sigmoid(x))
    ref = h_sigmoid_ref(x)
    assert out.shape == x.shape and out.dtype == x.dtype
    assert jnp.allclose(out, ref, atol=1e-6, rtol=1e-6), "f32 mismatch vs reference"

    # Element count not a multiple of 128 -> largest-divisor reshape
    # (single HBM pass, no pad / slice).
    x_odd = jax.random.normal(jax.random.PRNGKey(1), (2, 3, 7, 5), dtype=jnp.float32) * 4.0
    out_odd = jax.block_until_ready(h_sigmoid(x_odd))
    assert jnp.allclose(out_odd, h_sigmoid_ref(x_odd), atol=1e-6, rtol=1e-6), "odd-shape mismatch"

    # bf16 path (native-dtype arithmetic, 16-row sublane granularity).
    x_bf16 = (jax.random.normal(jax.random.PRNGKey(2), (2, 4, 16, 16)) * 4.0).astype(jnp.bfloat16)
    out_bf16 = jax.block_until_ready(h_sigmoid(x_bf16))
    assert out_bf16.dtype == jnp.bfloat16
    assert jnp.allclose(out_bf16.astype(jnp.float32),
                        h_sigmoid_ref(x_bf16).astype(jnp.float32),
                        atol=1e-2, rtol=1e-2), "bf16 mismatch vs reference"

    # Multi-step grid path (slab > 1 MiB -> >= 2 pipelined steps).
    x_big = jax.random.normal(jax.random.PRNGKey(3), (4, 128, 32, 32), dtype=jnp.float32)
    out_big = jax.block_until_ready(h_sigmoid(x_big))
    assert jnp.allclose(out_big, h_sigmoid_ref(x_big), atol=1e-6, rtol=1e-6), "big-shape mismatch"

    print("KERNEL_OK")
</pallas_src>

<mosaic_0001>
module attributes {stable_mosaic.version = 11 : i64} {
  func.func @_h_sigmoid_kernel(%arg0: i32, %arg1: memref<1x2048xf32, #tpu.memory_space<vmem>>, %arg2: memref<1x2048xf32, #tpu.memory_space<vmem>>) attributes {dimension_semantics = [#tpu.dimension_semantics<parallel>], iteration_bounds = array<i64: 1>, scalar_prefetch = 0 : i64, scratch_operands = 0 : i64, tpu.core_type = #tpu.core_type<tc>, window_params = [{transform_indices = @transform_0, window_bounds = array<i64: 1, 2048>}, {transform_indices = @transform_1, window_bounds = array<i64: 1, 2048>}]} {
    %c0 = arith.constant 0 : index
    %c0_0 = arith.constant 0 : index
    %0 = vector.load %arg1[%c0, %c0_0] : memref<1x2048xf32, #tpu.memory_space<vmem>>, vector<1x2048xf32>
    %cst = arith.constant 3.000000e+00 : f32
    %1 = vector.broadcast %cst : f32 to vector<1x2048xf32>
    %2 = arith.addf %0, %1 : vector<1x2048xf32>
    %cst_1 = arith.constant 0.000000e+00 : f32
    %cst_2 = arith.constant 6.000000e+00 : f32
    %3 = vector.broadcast %cst_1 : f32 to vector<1x2048xf32>
    %4 = arith.maximumf %3, %2 : vector<1x2048xf32>
    %5 = vector.broadcast %cst_2 : f32 to vector<1x2048xf32>
    %6 = arith.minimumf %5, %4 : vector<1x2048xf32>
    %cst_3 = arith.constant 0.166666672 : f32
    %7 = vector.broadcast %cst_3 : f32 to vector<1x2048xf32>
    %8 = arith.mulf %6, %7 : vector<1x2048xf32>
    %c0_4 = arith.constant 0 : index
    %c0_5 = arith.constant 0 : index
    %9 = vector.load %arg2[%c0_4, %c0_5] : memref<1x2048xf32, #tpu.memory_space<vmem>>, vector<1x2048xf32>
    tpu.vector_store %arg2[%c0_4, %c0_5], %8 {strides = array<i32>} : memref<1x2048xf32, #tpu.memory_space<vmem>>, vector<1x2048xf32>,
    return
  }
  func.func @transform_0(%arg0: i32) -> (i32, i32) {
    %c0_i32 = arith.constant 0 : i32
    %c0_i32_0 = arith.constant 0 : i32
    return %arg0, %c0_i32 : i32, i32
  }
  func.func @transform_1(%arg0: i32) -> (i32, i32) {
    %c0_i32 = arith.constant 0 : i32
    %c0_i32_0 = arith.constant 0 : i32
    return %arg0, %c0_i32 : i32, i32
  }
}

</mosaic_0001>

<bundles_post_ra>
// kernel: tpu_custom_call.1
= control target key start
LH: loop header
LB: loop body
LE: loop exit
PB: predicated region body
PF: predicated region fallthrough
CT: control target
= control target key end

     0   :  { %6 = vsyncpa [#allocation3], 0  ;;  %s112_s0 = inlined_call_operand.hbm [shape: f32[1,2048], index: 0, kind: input, shape index: {}]   ;;  %s113_s1 = inlined_call_operand.hbm [shape: f32[1,2048], index: 1, kind: output, shape index: {}]  }
   0x1   :  { %7 = vsyncpa [#allocation4], 0  ;;  %s94_s6 = smov [#allocation2]  }
   0x2   :  { %s14_s7 = sshll.u32 %s94_s6, 4  ;;  %s15_s7 = int_to_ptr.vmem [resolvable:$true] %s14_s7 }
   0x3   :  { %s58_s8 = scalar_lea.vmem %s15_s7, 256  ;;  %p63_p1 = scmp.lt.s32.totalorder %s15_s7, %s15_s7 }
   0x4   :  { %p59_p0 = scmp.ne.s32.totalorder %s15_s7, %s58_s8  ;;  %p64_p2 = scmp.lt.s32.totalorder %s58_s8, %s58_s8 }
   0x6   :  { %p65_p3 = por %p64_p2, %p63_p1 }
   0x8   :  { %p66_p4 = pnand %p65_p3, %p59_p0 }
   0xa   :  { %69 = shalt.err (!%p66_p4)
}
   0xb   :  { %17 = dma.hbm_to_vmem [thread:$0]  %s112_s0, 256, %s15_s7, [#allocation3]  }
   0xc   :  { %90 = dma.done.wait [#allocation3], 256  }
   0xd   :  { %91 = vsyncadd [#allocation3], 4294967040  ;;  %v21_v0 = vld [vmem:[#allocation2] sm:$0xff]  ;;  %v22_v1 = vld [vmem:[#allocation2 + $0x8] sm:$0xff]  ;;  %s95_s11 = smov [#allocation5]  }
   0xe   :  { %v23_v2 = vadd.f32 3.0, %v21_v0  ;;  %v24_v3 = vadd.f32 3.0, %v22_v1  ;;  %s39_s12 = sshll.u32 %s95_s11, 4  ;;  %s40_s12 = int_to_ptr.vmem [resolvable:$true] %s39_s12 }
   0xf   :  { %s70_s13 = scalar_lea.vmem %s40_s12, 256  ;;  %p75_p6 = scmp.lt.s32.totalorder %s40_s12, %s40_s12 }
  0x10   :  { %v25_v4 = vmax.f32 %v23_v2, 0.0  ;;  %v26_v5 = vmax.f32 %v24_v3, 0.0  ;;  %p71_p5 = scmp.ne.s32.totalorder %s40_s12, %s70_s13  ;;  %p76_p7 = scmp.lt.s32.totalorder %s70_s13, %s70_s13 }
  0x12   :  { %v27_v6 = vmin.f32 %v25_v4, 6.0  ;;  %v28_v7 = vmin.f32 %v26_v5, 6.0  ;;  %p77_p8 = por %p76_p7, %p75_p6 }
  0x14   :  { %v29_v8 = vmul.f32 0.16666667, %v27_v6  ;;  %v30_v9 = vmul.f32 0.16666667, %v28_v7  ;;  %p78_p9 = pnand %p77_p8, %p71_p5 }
  0x16   :  { %31 = vst [vmem:[#allocation5] sm:$0xff] %v29_v8  ;;  %32 = vst [vmem:[#allocation5 + $0x8] sm:$0xff] %v30_v9 }
  0x17   :  { %81 = shalt.err (!%p78_p9)
}
  0x18   :  { %42 = dma.vmem_to_hbm [thread:$0]  %s40_s12, 256, %s113_s1, [#allocation4]  }
  0x19   :  { %92 = dma.done.wait [#allocation4], 256  }
  0x1a   :  { %93 = vsyncadd [#allocation4], 4294967040 }
  0x1b   :  { %46 = vsyncpa [#allocation3], 1 }
  0x1c   :  { %47 = vsyncpa [#allocation4], 1 }

</bundles_post_ra>
